<compile_context>
chip_gen: v7x
topology: tpu7x:2x2x1
jax: 0.10.0
libtpu: 0.0.40
codegen_flags: <defaults>
</compile_context>

<pallas_src>
import jax
import jax.numpy as jnp
from jax.experimental import pallas as pl
from jax.experimental.pallas import tpu as pltpu


def _round_up(x, m):
    return ((x + m - 1) // m) * m


def bspline_knots_kernel(x_ref, w_ref, b_ref, o_ref):
    # Linear layer on the MXU: bf16 operands (cast in-kernel), f32 accumulate,
    # f32 bias add.
    lin = jnp.dot(x_ref[...].astype(jnp.bfloat16), w_ref[...],
                  preferred_element_type=jnp.float32)
    lin = lin + b_ref[...]

    # Symmetric closed form of N(2, 2, lin, t); continuous at all knots and
    # algebraically identical to the half-open-interval Cox-de Boor recursion.
    a = jnp.abs(lin)
    u = jnp.maximum(1.5 - a, 0.0)
    v = jnp.maximum(0.5 - a, 0.0)
    o_ref[...] = (0.5 * (u * u) - 1.5 * (v * v)).astype(o_ref.dtype)


def prepare_params(w, b):
    """One-time packing of nn.Linear params into the kernel layout.

    Hoisted out of the per-call forward path: transpose, bf16 cast, and
    zero-pad F_out up to a multiple of 128 (lane-dense output stores).

    w: [F_out, F_in] float32   (PyTorch nn.Linear layout)
    b: [F_out] float32
    returns (w_t [F_in, F_pad] bf16, b2d [1, F_pad] f32)
    """
    f_out, f_in = w.shape
    f_pad = _round_up(max(f_out, 128), 128)
    w_t = jnp.zeros((f_in, f_pad), jnp.bfloat16)
    w_t = w_t.at[:, :f_out].set(w.T.astype(jnp.bfloat16))
    b2d = jnp.zeros((1, f_pad), jnp.float32)
    b2d = b2d.at[0, :f_out].set(b.astype(jnp.float32))
    return w_t, b2d


def bsplines_knots_forward(x, w_t, b2d, f_out, *, tile_m=512, tile_n=512):
    """Forward pass of Bsplines_knots using pre-packed params.

    x:   [N, F_in] float32
    w_t: [F_in, F_pad] bfloat16   (from prepare_params)
    b2d: [1, F_pad] float32       (from prepare_params)
    returns: [N, f_out] float32
    """
    N, F_in = x.shape
    F_pad = w_t.shape[1]

    # Row tiling. Partial last block is handled by Pallas (masked writeback),
    # so no row padding. Ensure >= 2 row blocks when possible so both v7x
    # TensorCores get work.
    tile_m = min(tile_m, _round_up(N, 8))
    if pl.cdiv(N, tile_m) < 2 and N > 8:
        tile_m = _round_up(pl.cdiv(N, 2), 8)
    grid_m = pl.cdiv(N, tile_m)

    # Column tiling: lane-dense (multiple of 128) and dividing F_pad.
    tile_n = min(tile_n, F_pad)
    if F_pad % tile_n != 0:
        tile_n = 128
    grid_n = F_pad // tile_n

    out = pl.pallas_call(
        bspline_knots_kernel,
        out_shape=jax.ShapeDtypeStruct((N, F_pad), jnp.float32),
        grid_spec=pltpu.PrefetchScalarGridSpec(
            num_scalar_prefetch=0,
            grid=(grid_m, grid_n),
            in_specs=[
                pl.BlockSpec((tile_m, F_in), lambda i, j: (i, 0)),   # x rows
                pl.BlockSpec((F_in, tile_n), lambda i, j: (0, j)),   # W cols
                pl.BlockSpec((1, tile_n), lambda i, j: (0, j)),      # bias
            ],
            out_specs=pl.BlockSpec((tile_m, tile_n), lambda i, j: (i, j)),
        ),
        compiler_params=pltpu.CompilerParams(
            dimension_semantics=("parallel", "parallel"),
            vmem_limit_bytes=32 * 1024 * 1024),
    )(x, w_t, b2d)

    # Only the lane-padding column slice remains (skipped if already aligned).
    return out if F_pad == f_out else out[:, :f_out]


def reference_forward(x, w, b, *, mirror_bf16=True):
    """Pure-JAX reference using the original half-open-interval recursion."""
    if mirror_bf16:
        xr = x.astype(jnp.bfloat16).astype(jnp.float32)
        wr = w.astype(jnp.bfloat16).astype(jnp.float32)
    else:
        xr, wr = x, w
    lin = xr @ wr.T + b[None, :]
    n20 = ((lin >= -1.5) & (lin < -0.5)).astype(jnp.float32)
    n30 = ((lin >= -0.5) & (lin < 0.5)).astype(jnp.float32)
    n40 = ((lin >= 0.5) & (lin < 1.5)).astype(jnp.float32)
    n21 = (lin + 1.5) * n20 + (0.5 - lin) * n30
    n31 = (lin + 0.5) * n30 + (1.5 - lin) * n40
    return 0.5 * (lin + 1.5) * n21 + 0.5 * (1.5 - lin) * n31


if __name__ == "__main__":
    in_features, out_features = 32, 64
    batch = 128

    key = jax.random.PRNGKey(0)
    kx, kw, kb = jax.random.split(key, 3)

    # Deterministic init mimicking nn.Linear's U(-1/sqrt(in), 1/sqrt(in)).
    bound = 1.0 / jnp.sqrt(jnp.float32(in_features))
    w = jax.random.uniform(kw, (out_features, in_features), jnp.float32,
                           minval=-bound, maxval=bound)
    b = jax.random.uniform(kb, (out_features,), jnp.float32,
                           minval=-bound, maxval=bound)
    # NOTE: self.scale_0 / self.omega_0 are unused in forward(); not materialized.

    x = jax.random.normal(kx, (batch, in_features), jnp.float32)

    w_t, b2d = prepare_params(w, b)          # hoisted one-time param packing
    out = bsplines_knots_forward(x, w_t, b2d, out_features)
    out = jax.block_until_ready(out)

    assert out.shape == (batch, out_features)

    # Tight check vs. a reference mirroring the kernel's bf16 operand rounding.
    ref_bf = reference_forward(x, w, b, mirror_bf16=True)
    assert jnp.allclose(out, ref_bf, atol=1e-3, rtol=1e-3), float(
        jnp.max(jnp.abs(out - ref_bf)))

    # Loose check vs. the full-f32 nn.Linear reference (bf16 operand rounding
    # only; piecewise quadratic is continuous, so rounding stays O(eps)).
    ref_f32 = reference_forward(x, w, b, mirror_bf16=False)
    assert jnp.allclose(out, ref_f32, atol=5e-2, rtol=5e-2), float(
        jnp.max(jnp.abs(out - ref_f32)))

    print("KERNEL_OK")
</pallas_src>

<mosaic_0001>
module attributes {stable_mosaic.version = 11 : i64} {
  func.func @bspline_knots_kernel(%arg0: i32, %arg1: i32, %arg2: memref<64x32xf32, #tpu.memory_space<vmem>>, %arg3: memref<32x128xbf16, #tpu.memory_space<vmem>>, %arg4: memref<1x128xf32, #tpu.memory_space<vmem>>, %arg5: memref<64x128xf32, #tpu.memory_space<vmem>>) attributes {dimension_semantics = [#tpu.dimension_semantics<parallel>, #tpu.dimension_semantics<parallel>], iteration_bounds = array<i64: 2, 1>, scalar_prefetch = 0 : i64, scratch_operands = 0 : i64, tpu.core_type = #tpu.core_type<tc>, window_params = [{transform_indices = @transform_0, window_bounds = array<i64: 64, 32>}, {transform_indices = @transform_1, window_bounds = array<i64: 32, 128>}, {transform_indices = @transform_2, window_bounds = array<i64: 1, 128>}, {transform_indices = @transform_3, window_bounds = array<i64: 64, 128>}]} {
    %c0 = arith.constant 0 : index
    %c0_0 = arith.constant 0 : index
    %0 = vector.load %arg2[%c0, %c0_0] : memref<64x32xf32, #tpu.memory_space<vmem>>, vector<64x32xf32>
    %1 = arith.truncf %0 : vector<64x32xf32> to vector<64x32xbf16>
    %c0_1 = arith.constant 0 : index
    %c0_2 = arith.constant 0 : index
    %2 = vector.load %arg3[%c0_1, %c0_2] : memref<32x128xbf16, #tpu.memory_space<vmem>>, vector<32x128xbf16>
    %cst = arith.constant dense<0.000000e+00> : vector<64x128xf32>
    %3 = tpu.matmul %1, %2, %cst {dimension_numbers = #tpu.dot_dimension_numbers<[1], [0], [0], [1], [0, 0, 1, 1], [], []>} : vector<64x32xbf16>, vector<32x128xbf16>, vector<64x128xf32> -> vector<64x128xf32>
    %c0_3 = arith.constant 0 : index
    %c0_4 = arith.constant 0 : index
    %4 = vector.load %arg4[%c0_3, %c0_4] : memref<1x128xf32, #tpu.memory_space<vmem>>, vector<1x128xf32>
    %5 = vector.broadcast %4 : vector<1x128xf32> to vector<64x128xf32>
    %6 = arith.addf %3, %5 : vector<64x128xf32>
    %7 = math.absf %6 : vector<64x128xf32>
    %cst_5 = arith.constant 1.500000e+00 : f32
    %8 = vector.broadcast %cst_5 : f32 to vector<64x128xf32>
    %9 = arith.subf %8, %7 : vector<64x128xf32>
    %cst_6 = arith.constant 0.000000e+00 : f32
    %10 = vector.broadcast %cst_6 : f32 to vector<64x128xf32>
    %11 = arith.maximumf %9, %10 : vector<64x128xf32>
    %cst_7 = arith.constant 5.000000e-01 : f32
    %12 = vector.broadcast %cst_7 : f32 to vector<64x128xf32>
    %13 = arith.subf %12, %7 : vector<64x128xf32>
    %cst_8 = arith.constant 0.000000e+00 : f32
    %14 = vector.broadcast %cst_8 : f32 to vector<64x128xf32>
    %15 = arith.maximumf %13, %14 : vector<64x128xf32>
    %16 = arith.mulf %11, %11 : vector<64x128xf32>
    %cst_9 = arith.constant 5.000000e-01 : f32
    %17 = vector.broadcast %cst_9 : f32 to vector<64x128xf32>
    %18 = arith.mulf %17, %16 : vector<64x128xf32>
    %19 = arith.mulf %15, %15 : vector<64x128xf32>
    %cst_10 = arith.constant 1.500000e+00 : f32
    %20 = vector.broadcast %cst_10 : f32 to vector<64x128xf32>
    %21 = arith.mulf %20, %19 : vector<64x128xf32>
    %22 = arith.subf %18, %21 : vector<64x128xf32>
    %c0_11 = arith.constant 0 : index
    %c0_12 = arith.constant 0 : index
    %23 = vector.load %arg5[%c0_11, %c0_12] : memref<64x128xf32, #tpu.memory_space<vmem>>, vector<64x128xf32>
    tpu.vector_store %arg5[%c0_11, %c0_12], %22 {strides = array<i32>} : memref<64x128xf32, #tpu.memory_space<vmem>>, vector<64x128xf32>,
    return
  }
  func.func @transform_0(%arg0: i32, %arg1: i32) -> (i32, i32) {
    %c0_i32 = arith.constant 0 : i32
    %c0_i32_0 = arith.constant 0 : i32
    return %arg0, %c0_i32 : i32, i32
  }
  func.func @transform_1(%arg0: i32, %arg1: i32) -> (i32, i32) {
    %c0_i32 = arith.constant 0 : i32
    %c0_i32_0 = arith.constant 0 : i32
    return %c0_i32, %arg1 : i32, i32
  }
  func.func @transform_2(%arg0: i32, %arg1: i32) -> (i32, i32) {
    %c0_i32 = arith.constant 0 : i32
    %c0_i32_0 = arith.constant 0 : i32
    return %c0_i32, %arg1 : i32, i32
  }
  func.func @transform_3(%arg0: i32, %arg1: i32) -> (i32, i32) {
    %c0_i32 = arith.constant 0 : i32
    return %arg0, %arg1 : i32, i32
  }
}

</mosaic_0001>

<bundles_post_ra>
// kernel: tpu_custom_call.1
= control target key start
LH: loop header
LB: loop body
LE: loop exit
PB: predicated region body
PF: predicated region fallthrough
CT: control target
= control target key end

     0   :  { %8 = vsyncpa [#allocation3], 0  ;;  %s888_s0 = inlined_call_operand.vmem [shape: f32[128,32], index: 0, kind: input, shape index: {}]   ;;  %s889_s1 = inlined_call_operand.vmem [shape: bf16[32,128], index: 1, kind: input, shape index: {}]   ;;  %s890_s2 = inlined_call_operand.vmem [shape: f32[1,128], index: 2, kind: input, shape index: {}]   ;;  %s891_s3 = inlined_call_operand.hbm [shape: f32[128,128], index: 3, kind: output, shape index: {}]  }
   0x1   :  { %10 = vsyncpa [#allocation3 + $0x1], 0  ;;  %s740_s12 = smov 0   ;;  %s742_s13 = smov 0  }
   0x2   :  { %s744_s14 = smov 0   ;;  %s746_s15 = smov 0  }
   0x3   :  { %s748_s16 = smov 0   ;;  %s750_s17 = smov 0  }
   0x4 LB: > { %s533_s18 = sadd.s32 4294967295, %s715_s17   ;;  %s534_s19 = sadd.s32 4294967294, %s715_s17   ;;  %s715_s17 = sphi %s750_s17, %s16_s17   ;;  %s711_s16 = sphi %s748_s16, %s898_s16   ;;  %s707_s15 = sphi %s746_s15, %s897_s15   ;;  %s703_s14 = sphi %s744_s14, %s896_s14   ;;  %s699_s13 = sphi %s742_s13, %s895_s13   ;;  %s695_s12 = sphi %s740_s12, %s894_s12  }
   0x5   : > { %s28_s20 = sadd.s32 1, %s711_s16  ;;  %s115_s21 = sadd.s32 1, %s703_s14 }
   0x6   : > { %p30_p0 = scmp.ge.s32.totalorder %s28_s20, 2  ;;  %p125_p1 = scmp.ne.s32.totalorder %s703_s14, %s699_s13 }
   0x7   : > { %p126_p2 = scmp.eq.s32.totalorder %s533_s18, 1  ;;  %p131_p3 = scmp.ne.s32.totalorder %s699_s13, %s695_s12 }
   0x8   : > { %s900_s20 = smov (%p30_p0, %s28_s20), 0  ;;  %p132_p5 = scmp.eq.s32.totalorder %s534_s19, 1 }
   0x9   : > { %p780_p4 = por %p126_p2, %p125_p1  ;;  %s110_s23 = ssub.s32 %s711_s16, %s900_s20 }
   0xa   : > { %p539_p6 = scmp.ge.s32.totalorder %s715_s17, 1  ;;  %p113_p7 = scmp.eq.s32.totalorder %s110_s23, 0 }
   0xb   : > { %p787_p8 = por %p132_p5, %p131_p3  ;;  %p172_p9 = scmp.lt.s32.totalorder %s715_s17, 3 }
   0xc   : > { %s793_s25 = scalar_select %p113_p7, %s703_s14, %s115_s21  }
   0xd   : > { %p173_p10 = pnand %p539_p6, %p172_p9 }
   0xe   : > { %v635_v0 = vld [vmem:[%s889_s1] sm:$0xff] (!%p173_p10)   ;;  %s541_s28 = sshll.u32 (!%p173_p10), %s707_s15, 3  ;;  %v636_v1 = vld [vmem:[%s889_s1 + $0x8] sm:$0xff] (!%p173_p10)   ;;  %vm253_vm0 = vcmask (!%p173_p10), 261120   ;;  %s200_s10 = sand.u32 (!%p173_p10), 1, %s699_s13  }
   0xf   : > { %176 = sbr.rel (%p173_p10) target bundleno = 285 (0x11d), region = 32  ;;  %p204_p11 = scmp.lt.s32.totalorder (!%p173_p10), %s541_s28, 15  ;;  %562 = vmatprep.subr.bf16.mxu0 (!%p173_p10), %v635_v0  ;;  %574 = vmatprep.subr.bf16.mxu1 (!%p173_p10), %v635_v0  ;;  %v808_v14 = vld [vmem:[%s890_s2] ss:$0 sm:$0xff] (!%p173_p10) }
  0x10   : > { %563 = vmatpush3.bf16.msra.mxu0 (!%p173_p10), %v635_v0  ;;  %576 = vmatpush3.bf16.msra.mxu1 (!%p173_p10), %v635_v0  ;;  %s540_s11 = sshll.u32 (!%p173_p10), %s200_s10, 6  ;;  %s555_s19 = sshll.u32 (!%p173_p10), %s707_s15, 10 }
  0x11   : > { %564 = vmatprep.subr.bf16.mxu0 (!%p173_p10), %v636_v1  ;;  %575 = vmatprep.subr.bf16.mxu1 (!%p173_p10), %v636_v1  ;;  %s820_s18 = scalar_lea.vmem (!%p173_p10), [#allocation2], %s540_s11  ;;  %s835_s27 = scalar_lea.hbm (!%p173_p10), %s891_s3, %s555_s19 }
  0x12   : > { %s434_s21 = sshll.u32 (!%p173_p10), %s820_s18, 4  ;;  %s842_s15 = scalar_lea.sflag (!%p173_p10), [#allocation3], %s200_s10  ;;  %s837_s21 = int_to_ptr.vmem [resolvable:$true] %s434_s21 }
  0x13   : > { %s717_s29 = smov (!%p173_p10), [#allocation2]  }
  0x14   : > { %565 = vmatpush3.bf16.msra.mxu0 (!%p173_p10), %v636_v1  ;;  %577 = vmatpush3.bf16.msra.mxu1 (!%p173_p10), %v636_v1  ;;  %s641_s30 = sshll.u32 (!%p173_p10), %s717_s29, 4  ;;  %s642_s30 = int_to_ptr.vmem [resolvable:$false] %s641_s30 }
  0x15   : > { %p644_p1 = scmp.lt.s32.totalorder (!%p173_p10), %s837_s21, %s642_s30 }
  0x16   : > { %s902_s28 = smov (!%p204_p11, %s541_s28), 15 }
  0x17   : > { %s542_s4 = sshll.u32 %s902_s28, 3  ;;  %s637_s28 = scalar_lea.vmem %s837_s21, 1024 }
  0x18   : > { %s207_s7 = scalar_lea.vmem %s888_s0, %s542_s4  ;;  %p638_p12 = scmp.ne.s32.totalorder %s837_s21, %s637_s28 }
  0x19   : > { %v218_v2 = vld [vmem:[%s207_s7] sm:$0xff]  ;;  %v219_v3 = vld [vmem:[%s207_s7 + $0x8] sm:$0xff]  ;;  %v220_v7 = vld [vmem:[%s207_s7 + $0x10] sm:$0xff]  ;;  %s643_s4 = scalar_lea.vmem %s642_s30, 2048 }
  0x1a   : > { %v222_v4 = vld [vmem:[%s207_s7 + $0x20] sm:$0xff]  ;;  %v226_v5 = vpack.c.bf16 %v219_v3, %v218_v2  ;;  %v223_v6 = vld [vmem:[%s207_s7 + $0x28] sm:$0xff]  ;;  %v221_v8 = vld [vmem:[%s207_s7 + $0x18] sm:$0xff]  ;;  %p639_p13 = pnand %p638_p12, %p780_p4  ;;  %p645_p2 = scmp.lt.s32.totalorder %s643_s4, %s637_s28 }
  0x1b   : > { %v228_v9 = vpack.c.bf16 %v223_v6, %v222_v4  ;;  %v227_v10 = vpack.c.bf16 %v221_v8, %v220_v7  ;;  %v224_v11 = vld [vmem:[%s207_s7 + $0x30] sm:$0xff]  ;;  %v225_v12 = vld [vmem:[%s207_s7 + $0x38] sm:$0xff] }
  0x1c   : > { %566 = vmatprep.mubr.msk.bf16.mxu0 %vm253_vm0, %v226_v5  ;;  %v229_v13 = vpack.c.bf16 %v225_v12, %v224_v11  ;;  %p640_p0 = pneg %p639_p13  ;;  %p646_p3 = por %p645_p2, %p644_p1 }
  0x1d   : > { %570 = vmatprep.mubr.msk.bf16.mxu1 %vm253_vm0, %v228_v9  ;;  %567 = vmatmul.mubr.msk.bf16.vlgmr.msra.gmra.mrb[0].mxu0 %vm253_vm0, %v227_v10 }
  0x1e   : > { %571 = vmatmul.mubr.msk.bf16.vlgmr.msra.gmra.mrb[0].mxu1 %vm253_vm0, %v229_v13  ;;  %p647_p5 = pnand %p646_p3, %p640_p0 }
  0xf0   : > { %v568_v15 = vpop.f32.mrb[0].mxu0 }
  0xf1   : > { %v309_v16 = vadd.f32 %v568_v15, %v808_v14  ;;  %v572_v17 = vpop.f32.mrb[0].mxu1  ;;  %v300_v18 = vpop.f32.mrb[1].mxu0 }
  0xf2   : > { %v325_v19 = vadd.f32 %v572_v17, %v808_v14  ;;  %v301_v20 = vadd.f32 %v808_v14, %v300_v18  ;;  %v316_v21 = vpop.f32.mrb[1].mxu1  ;;  %v569_v22 = vpop.f32.mrb[2].mxu0 }
  0xf3   : > { %v333_v23 = vand.u32 2147483647, %v309_v16  ;;  %v317_v24 = vadd.f32 %v808_v14, %v316_v21  ;;  %v312_v25 = vadd.f32 %v569_v22, %v808_v14  ;;  %v573_v26 = vpop.f32.mrb[2].mxu1  ;;  %v303_v27 = vpop.f32.mrb[3].mxu0 }
  0xf4   : > { %v337_v28 = vand.u32 2147483647, %v325_v19  ;;  %v331_v29 = vand.u32 2147483647, %v301_v20  ;;  %v328_v30 = vadd.f32 %v573_v26, %v808_v14  ;;  %v304_v31 = vadd.f32 %v808_v14, %v303_v27  ;;  %v319_v32 = vpop.f32.mrb[3].mxu1 }
  0xf5   : > { %v341_v33 = vsub.f32 1.5, %v333_v23  ;;  %v357_v34 = vsub.f32 0.5, %v333_v23  ;;  %v335_v35 = vand.u32 2147483647, %v317_v24  ;;  %v334_v36 = vand.u32 2147483647, %v312_v25 }
  0xf6   : > { %v345_v37 = vsub.f32 1.5, %v337_v28  ;;  %v361_v38 = vsub.f32 0.5, %v337_v28  ;;  %v339_v39 = vsub.f32 1.5, %v331_v29  ;;  %v355_v40 = vsub.f32 0.5, %v331_v29 }
  0xf7   : > { %v349_v41 = vmax.f32 %v341_v33, 0.0  ;;  %v365_v42 = vmax.f32 %v357_v34, 0.0  ;;  %v343_v43 = vsub.f32 1.5, %v335_v35  ;;  %v359_v44 = vsub.f32 0.5, %v335_v35 }
  0xf8   : > { %v353_v45 = vmax.f32 %v345_v37, 0.0  ;;  %v369_v46 = vmax.f32 %v361_v38, 0.0  ;;  %v347_v47 = vmax.f32 %v339_v39, 0.0  ;;  %v363_v48 = vmax.f32 %v355_v40, 0.0 }
  0xf9   : > { %v373_v49 = vmul.f32 %v349_v41, %v349_v41  ;;  %v389_v50 = vmul.f32 %v365_v42, %v365_v42  ;;  %v351_v51 = vmax.f32 %v343_v43, 0.0  ;;  %v367_v52 = vmax.f32 %v359_v44, 0.0 }
  0xfa   : > { %v377_v53 = vmul.f32 %v353_v45, %v353_v45  ;;  %v393_v54 = vmul.f32 %v369_v46, %v369_v46  ;;  %v371_v55 = vmul.f32 %v347_v47, %v347_v47  ;;  %v387_v56 = vmul.f32 %v363_v48, %v363_v48 }
  0xfb   : > { %v381_v57 = vmul.f32 0.5, %v373_v49  ;;  %v397_v58 = vmul.f32 1.5, %v389_v50  ;;  %v375_v59 = vmul.f32 %v351_v51, %v351_v51  ;;  %v391_v60 = vmul.f32 %v367_v52, %v367_v52 }
  0xfc   : > { %v385_v61 = vmul.f32 0.5, %v377_v53  ;;  %v401_v62 = vmul.f32 1.5, %v393_v54  ;;  %v379_v63 = vmul.f32 0.5, %v371_v55  ;;  %v395_v0 = vmul.f32 1.5, %v387_v56 }
  0xfd   : > { %v405_v1 = vsub.f32 %v381_v57, %v397_v58  ;;  %v383_v2 = vmul.f32 0.5, %v375_v59  ;;  %v399_v3 = vmul.f32 1.5, %v391_v60  ;;  %v342_v4 = vsub.f32 1.5, %v334_v36 }
  0xfe   : > { %v409_v5 = vsub.f32 %v385_v61, %v401_v62  ;;  %v403_v6 = vsub.f32 %v379_v63, %v395_v0  ;;  %v358_v7 = vsub.f32 0.5, %v334_v36  ;;  %v338_v8 = vand.u32 2147483647, %v328_v30 }
  0xff   : > { %413 = vst [vmem:[%s820_s18 + $0x10] sm:$0xff] %v405_v1  ;;  %v407_v9 = vsub.f32 %v383_v2, %v399_v3  ;;  %v350_v10 = vmax.f32 %v342_v4, 0.0  ;;  %v332_v11 = vand.u32 2147483647, %v304_v31  ;;  %v320_v12 = vadd.f32 %v808_v14, %v319_v32 }
 0x100   : > { %417 = vst [vmem:[%s820_s18 + $0x30] sm:$0xff] %v409_v5  ;;  %411 = vst [vmem:[%s820_s18] sm:$0xff] %v403_v6  ;;  %v366_v13 = vmax.f32 %v358_v7, 0.0  ;;  %v346_v15 = vsub.f32 1.5, %v338_v8  ;;  %v362_v16 = vsub.f32 0.5, %v338_v8 }
 0x101   : > { %415 = vst [vmem:[%s820_s18 + $0x20] sm:$0xff] %v407_v9  ;;  %v374_v17 = vmul.f32 %v350_v10, %v350_v10  ;;  %v340_v18 = vsub.f32 1.5, %v332_v11  ;;  %v356_v19 = vsub.f32 0.5, %v332_v11  ;;  %v336_v20 = vand.u32 2147483647, %v320_v12 }
 0x102   : > { %v390_v21 = vmul.f32 %v366_v13, %v366_v13  ;;  %v354_v22 = vmax.f32 %v346_v15, 0.0  ;;  %v370_v23 = vmax.f32 %v362_v16, 0.0 }
 0x103   : > { %v382_v24 = vmul.f32 0.5, %v374_v17  ;;  %v348_v25 = vmax.f32 %v340_v18, 0.0  ;;  %v364_v26 = vmax.f32 %v356_v19, 0.0  ;;  %v344_v27 = vsub.f32 1.5, %v336_v20 }
 0x104   : > { %v398_v28 = vmul.f32 1.5, %v390_v21  ;;  %v378_v14 = vmul.f32 %v354_v22, %v354_v22  ;;  %v394_v29 = vmul.f32 %v370_v23, %v370_v23  ;;  %v360_v30 = vsub.f32 0.5, %v336_v20 }
 0x105   : > { %v372_v31 = vmul.f32 %v348_v25, %v348_v25  ;;  %v388_v32 = vmul.f32 %v364_v26, %v364_v26  ;;  %v352_v33 = vmax.f32 %v344_v27, 0.0 }
 0x106   : > { %v406_v34 = vsub.f32 %v382_v24, %v398_v28  ;;  %v386_v35 = vmul.f32 0.5, %v378_v14  ;;  %v402_v36 = vmul.f32 1.5, %v394_v29  ;;  %v368_v37 = vmax.f32 %v360_v30, 0.0 }
 0x107   : > { %v380_v38 = vmul.f32 0.5, %v372_v31  ;;  %v396_v39 = vmul.f32 1.5, %v388_v32  ;;  %v376_v40 = vmul.f32 %v352_v33, %v352_v33 }
 0x108   : > { %414 = vst [vmem:[%s820_s18 + $0x18] sm:$0xff] %v406_v34  ;;  %v410_v41 = vsub.f32 %v386_v35, %v402_v36  ;;  %v392_v42 = vmul.f32 %v368_v37, %v368_v37 }
 0x109   : > { %v404_v43 = vsub.f32 %v380_v38, %v396_v39  ;;  %v384_v44 = vmul.f32 0.5, %v376_v40 }
 0x10a   : > { %418 = vst [vmem:[%s820_s18 + $0x38] sm:$0xff] %v410_v41  ;;  %v400_v45 = vmul.f32 1.5, %v392_v42 }
 0x10b   : > { %412 = vst [vmem:[%s820_s18 + $0x8] sm:$0xff] %v404_v43 }
 0x10c   : > { %v408_v46 = vsub.f32 %v384_v44, %v400_v45 }
 0x10e   : > { %416 = vst [vmem:[%s820_s18 + $0x28] sm:$0xff] %v408_v46 }
 0x10f   : > { %650 = shalt.err (!%p647_p5)
}
 0x110   : > { %s651_s5 = scalar_lea.hbm %s835_s27, 1024  ;;  %s655_s8 = scalar_lea.hbm %s891_s3, 2048 }
 0x111   : > { %p652_p6 = scmp.ne.s32.totalorder %s835_s27, %s651_s5  ;;  %p656_p10 = scmp.lt.u32.totalorder %s835_s27, %s891_s3 }
 0x112   : > { %p657_p11 = scmp.lt.u32.totalorder %s655_s8, %s651_s5  ;;  %p659_p13 = scmp.lt.u32.totalorder %s651_s5, %s835_s27 }
 0x113   : > { %p653_p7 = pnand %p652_p6, %p780_p4 }
 0x114   : > { %p658_p12 = por %p657_p11, %p656_p10 }
 0x115   : > { %p654_p9 = pneg %p653_p7 }
 0x116   : > { %p660_p0 = por %p659_p13, %p658_p12 }
 0x118   : > { %p661_p1 = pnand %p660_p0, %p654_p9 }
 0x11a   : > { %664 = shalt.err (!%p661_p1)
}
 0x11b   : > { %s718_s11 = smov 128   ;;  %s719_s18 = smov 8  }
 0x11c   : > { %578 = dma.vmem_to_hbm [thread:$0]  (%p780_p4), %s837_s21, 1024, %s835_s27, %s842_s15, %s718_s11, %s718_s11, %s719_s18  }
 0x11d PF: > { %p584_p2 = scmp.ge.s32.totalorder %s715_s17, 2  ;;  %s449_s19 = sand.u32 1, %s695_s12  }
 0x11e   : > { %s450_s23 = scalar_lea.sflag [#allocation3], %s449_s19 }
 0x11f   : > { %p581_p3 = pnand %p584_p2, %p787_p8 }
 0x121   : > { %690 = dma.done.wait (!%p581_p3), %s450_s23, 1024  }
 0x122   : > { %692 = vsyncadd (!%p581_p3), %s450_s23, 4294966272  ;;  %s16_s17 = sadd.s32 1, %s715_s17   ;;  %s894_s12 = smov %s699_s13 }
 0x123   : > { %p13_p5 = scmp.ge.s32.totalorder %s16_s17, 4   ;;  %s895_s13 = smov %s703_s14 }
 0x124   : > { %s896_s14 = smov %s793_s25  ;;  %s897_s15 = smov %s711_s16 }
 0x125   : > { %s898_s16 = smov %s900_s20  ;;  %15 = sbr.rel (!%p13_p5) target bundleno = 4 (0x4), region = 73 }
 0x12c   :  { %455 = vsyncpa [#allocation3], 1 }
 0x12d   :  { %457 = vsyncpa [#allocation3 + $0x1], 1 }

</bundles_post_ra>
